<compile_context>
chip_gen: v5e
topology: v5e:2x2
jax: 0.10.0
libtpu: 0.0.40
codegen_flags: <defaults>
</compile_context>

<pallas_src>
import jax
import jax.numpy as jnp
from jax.experimental import pallas as pl
from jax.experimental.pallas import tpu as pltpu


def _round_up(x, m):
    return (x + m - 1) // m * m


def _vmem_capacity_bytes():
    """Physical VMEM of the local TPU generation (fallback: 64 MiB, v7x-safe)."""
    try:
        cap = getattr(pltpu.get_tpu_info(), "vmem_capacity_bytes", None)
        if cap:
            return int(cap)
    except Exception:
        pass
    return 64 << 20


def _block_vmem_bytes(tm, kp, dp, out_bytes):
    # patch + pos + out blocks are double-buffered by the pipeline; the weight
    # block is grid-invariant but budgeted at 2 buffers to stay conservative.
    return 2 * tm * (kp * 2 + dp * 2 + dp * out_bytes) + 2 * kp * dp * 2


def _pick_tm(m, kp, dp, out_bytes, usable_vmem):
    """Largest TM (multiple of 256, <= 2048) whose blocks fit usable_vmem."""
    tm_unit = 256
    tm = tm_unit
    while (tm + tm_unit <= 2048
           and _block_vmem_bytes(tm + tm_unit, kp, dp, out_bytes) <= usable_vmem):
        tm += tm_unit
    if m <= tm:                      # tiny problems: don't over-pad the rows
        tm = max(_round_up(m, 16), 16)
    return tm


def _patch_embed_kernel(x_ref, w_ref, pos_ref, o_ref):
    # x_ref:   (1, TM, Kp) bf16 — one row-tile of one batch element's patches
    # w_ref:   (Kp, Dp)    bf16 — flattened conv weight (grid-invariant)
    # pos_ref: (TM, Dp)    bf16 — conv bias + temporal + spatial pos row-tile
    # o_ref:   (1, TM, Dp)
    acc = jnp.dot(x_ref[0], w_ref[...], preferred_element_type=jnp.float32)
    o_ref[0] = (acc + pos_ref[...].astype(jnp.float32)).astype(o_ref.dtype)


def patch_embed_pallas(x, conv_w, conv_b, spatial_pos, temporal_pos, patch_size,
                       out_dtype=None):
    """x: (B, T, C, H, W) -> (B*T, N, D), matching PatchEmbed.forward."""
    B, T, C, H, W = x.shape
    P = patch_size
    D = conv_w.shape[0]
    Hp, Wp = H // P, W // P
    N = Hp * Wp
    K = C * P * P
    M = T * N                              # patch rows per batch element
    Kp = _round_up(K, 128)                 # lane-aligned contraction dim
    Dp = _round_up(D, 128)                 # lane-dense output width
    out_dtype = x.dtype if out_dtype is None else out_dtype
    out_bytes = jnp.dtype(out_dtype).itemsize

    # ---- generation-aware row-tile size (budget-driven, not clamp-driven) ----
    cap = _vmem_capacity_bytes()
    usable = max(min(cap - (8 << 20), 112 << 20), 16 << 20)
    tm = _pick_tm(M, Kp, Dp, out_bytes, usable)
    num_m = pl.cdiv(M, tm)
    Mp = num_m * tm
    vmem_need = _block_vmem_bytes(tm, Kp, Dp, out_bytes)
    vmem_limit = int(min(max(vmem_need + (4 << 20), 16 << 20), cap))

    # ---- host glue: im2col, weight flatten, bias+pos fold, lane padding ----
    xf = x.reshape(B, T, C, Hp, P, Wp, P)
    # (B, T, Hp, Wp, C, P, P) -> (B, M, K); K ordering matches conv_w.reshape(D, K)
    patches = jnp.transpose(xf, (0, 1, 3, 5, 2, 4, 6)).reshape(B, M, K)
    patches = patches.astype(jnp.bfloat16)
    if (Mp, Kp) != (M, K):
        patches = jnp.pad(patches, ((0, 0), (0, Mp - M), (0, Kp - K)))

    w_mat = conv_w.reshape(D, K).T.astype(jnp.bfloat16)          # (K, D)
    if (Kp, Dp) != (K, D):
        w_mat = jnp.pad(w_mat, ((0, Kp - K), (0, Dp - D)))       # (Kp, Dp)

    tpos = temporal_pos.reshape(T, D)                            # (T, D)
    spos = spatial_pos.reshape(D, N).T                           # (N, D)
    pos = conv_b[None, None, :] + tpos[:, None, :] + spos[None, :, :]   # (T, N, D)
    pos = pos.reshape(M, D).astype(jnp.bfloat16)
    if (Mp, Dp) != (M, D):
        pos = jnp.pad(pos, ((0, Mp - M), (0, Dp - D)))           # (Mp, Dp)

    cost = pl.CostEstimate(
        flops=2 * B * Mp * Kp * Dp,
        transcendentals=0,
        bytes_accessed=int(patches.size * 2 + w_mat.size * 2
                           + pos.size * 2 + B * Mp * Dp * out_bytes),
    )

    out = pl.pallas_call(
        _patch_embed_kernel,
        out_shape=jax.ShapeDtypeStruct((B, Mp, Dp), out_dtype),
        grid_spec=pltpu.PrefetchScalarGridSpec(
            num_scalar_prefetch=0,
            grid=(B, num_m),
            in_specs=[
                pl.BlockSpec((1, tm, Kp), lambda b, m: (b, m, 0)),
                pl.BlockSpec((Kp, Dp), lambda b, m: (0, 0)),
                pl.BlockSpec((tm, Dp), lambda b, m: (m, 0)),
            ],
            out_specs=pl.BlockSpec((1, tm, Dp), lambda b, m: (b, m, 0)),
        ),
        compiler_params=pltpu.CompilerParams(
            dimension_semantics=("parallel", "parallel"),
            vmem_limit_bytes=vmem_limit,
        ),
        cost_estimate=cost,
    )(patches, w_mat, pos)

    if (Mp, Dp) != (M, D):
        out = out[:, :M, :D]       # only taken when row/width padding was needed
    return out.reshape(B * T, N, D)


if __name__ == "__main__":
    # Small shapes consistent with the module: B=2, T=2, C=3, H=W=16, P=4,
    # patch_dim D=32  ->  Hp=Wp=4, N=16, K=48, M=T*N=32.
    B, T, C, H, W = 2, 2, 3, 16, 16
    P = 4
    D = 32
    Hp, Wp = H // P, W // P

    key = jax.random.PRNGKey(0)
    k_x, k_w, k_b, k_sp, k_tp = jax.random.split(key, 5)

    x = jax.random.normal(k_x, (B, T, C, H, W), dtype=jnp.float32)
    conv_w = jax.random.normal(k_w, (D, C, P, P), dtype=jnp.float32) * 0.05
    conv_b = jax.random.normal(k_b, (D,), dtype=jnp.float32) * 0.05
    # trunc_normal_(std=0.02) approximated with plain normal * 0.02 (synthetic)
    spatial_pos = jax.random.normal(k_sp, (1, 1, D, Hp, Wp), dtype=jnp.float32) * 0.02
    temporal_pos = jax.random.normal(k_tp, (1, T, D, 1, 1), dtype=jnp.float32) * 0.02

    out = patch_embed_pallas(x, conv_w, conv_b, spatial_pos, temporal_pos, P)
    out = jax.block_until_ready(out)

    # Pure-JAX f32 reference (kernel matmul runs in bf16 -> relaxed tolerance;
    # intentional precision tradeoff for MXU-native operands).
    xf = x.reshape(B * T, C, Hp, P, Wp, P)
    patches_ref = jnp.transpose(xf, (0, 2, 4, 1, 3, 5)).reshape(B * T, Hp * Wp, C * P * P)
    ref = patches_ref @ conv_w.reshape(D, -1).T + conv_b[None, None, :]
    ref = ref.reshape(B, T, Hp * Wp, D)
    ref = ref + temporal_pos.reshape(1, T, 1, D) + spatial_pos.reshape(D, Hp * Wp).T[None, None]
    ref = ref.reshape(B * T, Hp * Wp, D)

    assert out.shape == (B * T, Hp * Wp, D)
    assert jnp.allclose(out, ref, atol=5e-2, rtol=5e-2), float(jnp.abs(out - ref).max())
    print("KERNEL_OK")
</pallas_src>

<mosaic_0001>
module attributes {stable_mosaic.version = 11 : i64} {
  func.func @_patch_embed_kernel(%arg0: i32, %arg1: i32, %arg2: memref<1x32x128xbf16, #tpu.memory_space<vmem>>, %arg3: memref<128x128xbf16, #tpu.memory_space<vmem>>, %arg4: memref<32x128xbf16, #tpu.memory_space<vmem>>, %arg5: memref<1x32x128xf32, #tpu.memory_space<vmem>>) attributes {dimension_semantics = [#tpu.dimension_semantics<parallel>, #tpu.dimension_semantics<parallel>], iteration_bounds = array<i64: 2, 1>, scalar_prefetch = 0 : i64, scratch_operands = 0 : i64, tpu.core_type = #tpu.core_type<tc>, window_params = [{transform_indices = @transform_0, window_bounds = array<i64: 1, 32, 128>}, {pipeline_mode = #tpu.pipeline_mode<synchronous>, transform_indices = @transform_1, window_bounds = array<i64: 128, 128>}, {transform_indices = @transform_2, window_bounds = array<i64: 32, 128>}, {transform_indices = @transform_3, window_bounds = array<i64: 1, 32, 128>}]} {
    %c0 = arith.constant 0 : index
    %c0_0 = arith.constant 0 : index
    %c0_1 = arith.constant 0 : index
    %0 = vector.load %arg2[%c0, %c0_0, %c0_1] : memref<1x32x128xbf16, #tpu.memory_space<vmem>>, vector<1x32x128xbf16>
    %1 = vector.shape_cast %0 : vector<1x32x128xbf16> to vector<32x128xbf16>
    %c0_2 = arith.constant 0 : index
    %c0_3 = arith.constant 0 : index
    %2 = vector.load %arg3[%c0_2, %c0_3] : memref<128x128xbf16, #tpu.memory_space<vmem>>, vector<128x128xbf16>
    %cst = arith.constant dense<0.000000e+00> : vector<32x128xf32>
    %3 = tpu.matmul %1, %2, %cst {dimension_numbers = #tpu.dot_dimension_numbers<[1], [0], [0], [1], [0, 0, 1, 1], [], []>} : vector<32x128xbf16>, vector<128x128xbf16>, vector<32x128xf32> -> vector<32x128xf32>
    %c0_4 = arith.constant 0 : index
    %c0_5 = arith.constant 0 : index
    %4 = vector.load %arg4[%c0_4, %c0_5] : memref<32x128xbf16, #tpu.memory_space<vmem>>, vector<32x128xbf16>
    %5 = arith.extf %4 : vector<32x128xbf16> to vector<32x128xf32>
    %6 = arith.addf %3, %5 : vector<32x128xf32>
    %c0_6 = arith.constant 0 : index
    %c0_7 = arith.constant 0 : index
    %c0_8 = arith.constant 0 : index
    %7 = vector.load %arg5[%c0_6, %c0_7, %c0_8] : memref<1x32x128xf32, #tpu.memory_space<vmem>>, vector<1x32x128xf32>
    %8 = vector.shape_cast %7 : vector<1x32x128xf32> to vector<32x128xf32>
    %9 = vector.shape_cast %6 : vector<32x128xf32> to vector<1x32x128xf32>
    tpu.vector_store %arg5[%c0_6, %c0_7, %c0_8], %9 {strides = array<i32>} : memref<1x32x128xf32, #tpu.memory_space<vmem>>, vector<1x32x128xf32>,
    return
  }
  func.func @transform_0(%arg0: i32, %arg1: i32) -> (i32, i32, i32) {
    %c0_i32 = arith.constant 0 : i32
    %c0_i32_0 = arith.constant 0 : i32
    return %arg0, %arg1, %c0_i32 : i32, i32, i32
  }
  func.func @transform_1(%arg0: i32, %arg1: i32) -> (i32, i32) {
    %c0_i32 = arith.constant 0 : i32
    %c0_i32_0 = arith.constant 0 : i32
    %c0_i32_1 = arith.constant 0 : i32
    return %c0_i32, %c0_i32_0 : i32, i32
  }
  func.func @transform_2(%arg0: i32, %arg1: i32) -> (i32, i32) {
    %c0_i32 = arith.constant 0 : i32
    %c0_i32_0 = arith.constant 0 : i32
    return %arg1, %c0_i32 : i32, i32
  }
  func.func @transform_3(%arg0: i32, %arg1: i32) -> (i32, i32, i32) {
    %c0_i32 = arith.constant 0 : i32
    %c0_i32_0 = arith.constant 0 : i32
    return %arg0, %arg1, %c0_i32 : i32, i32, i32
  }
}

</mosaic_0001>

<bundles_post_ra>
// kernel: tpu_custom_call.1
= control target key start
LH: loop header
LB: loop body
LE: loop exit
PB: predicated region body
PF: predicated region fallthrough
CT: control target
= control target key end

     0   :  { %8 = vsyncpa [#allocation3], 0  ;;  %s1025_s0 = inlined_call_operand.hbm [shape: bf16[2,32,128], index: 0, kind: input, shape index: {}]   ;;  %s1026_s1 = inlined_call_operand.hbm [shape: bf16[128,128], index: 1, kind: input, shape index: {}]   ;;  %s1027_s2 = inlined_call_operand.hbm [shape: bf16[32,128], index: 2, kind: input, shape index: {}]   ;;  %s1028_s3 = inlined_call_operand.hbm [shape: f32[2,32,128], index: 3, kind: output, shape index: {}]  }
   0x1   :  { %10 = vsyncpa [#allocation3 + $0x1], 0 }
   0x2   :  { %11 = vsyncpa [#allocation6], 0 }
   0x3   :  { %12 = vsyncpa [#allocation4], 0 }
   0x4   :  { %14 = vsyncpa [#allocation4 + $0x1], 0  ;;  %s869_s12 = smov 0   ;;  %s871_s13 = smov 0  }
   0x5   :  { %s873_s14 = smov 0   ;;  %s875_s15 = smov 0  }
   0x6   :  { %s877_s16 = smov 0   ;;  %s879_s17 = smov 0  }
   0x7 LB: > { %s490_s18 = sadd.s32 4294967295, %s841_s17   ;;  %s491_s19 = sadd.s32 4294967294, %s841_s17   ;;  %s841_s17 = sphi %s879_s17, %s20_s17   ;;  %s837_s16 = sphi %s877_s16, %s1038_s16   ;;  %s833_s15 = sphi %s875_s15, %s1037_s15   ;;  %s829_s14 = sphi %s873_s14, %s1036_s14   ;;  %s825_s13 = sphi %s871_s13, %s1035_s13   ;;  %s821_s12 = sphi %s869_s12, %s1034_s12  }
   0x8   : > { %p54_p0 = scmp.ne.s32.totalorder %s825_s13, %s821_s12  ;;  %p905_p1 = scmp.eq.s32.totalorder %s490_s18, 0 }
   0x9   : > { %p133_p2 = scmp.eq.s32.totalorder %s491_s19, 1  ;;  %p492_p4 = scmp.ge.s32.totalorder %s841_s17, 1 }
   0xa   : > { %p911_p3 = por %p905_p1, %p54_p0  ;;  %p140_p6 = scmp.lt.s32.totalorder %s841_s17, 3 }
   0xb   : > { %p916_p5 = por %p133_p2, %p54_p0  ;;  %s151_s25 = sshll.u32 %s1026_s1, 4  ;;  %s152_s25 = int_to_ptr.hbm [resolvable:$true] %s151_s25 }
   0xc   : > { %p924_p7 = pnand %p492_p4, %p140_p6  ;;  %s843_s27 = smov [#allocation5]  }
   0xd   : > { %s153_s28 = sshll.u32 %s843_s27, 4  ;;  %p495_p10 = scmp.ge.s32.totalorder %s841_s17, 2  ;;  %s154_s28 = int_to_ptr.vmem [resolvable:$true] %s153_s28 }
   0xe   : > { %p590_p8 = pneg %p924_p7  ;;  %s168_s4 = sshll.u32 %s1027_s2, 4  ;;  %s169_s4 = int_to_ptr.hbm [resolvable:$true] %s168_s4 }
   0xf   : > { %s844_s5 = smov 64   ;;  %s845_s6 = smov 4  }
  0x10   : > { %p591_p9 = pnand %p590_p8, %p905_p1  ;;  %s846_s7 = smov [#allocation7]  }
  0x11   : > { %s170_s8 = sshll.u32 %s846_s7, 4  ;;  %p127_p11 = scmp.eq.s32.totalorder %s490_s18, 1  ;;  %s171_s8 = int_to_ptr.vmem [resolvable:$true] %s170_s8 }
  0x12   : > { %593 = dma.hbm_to_vmem [thread:$0]  (!%p591_p9), %s152_s25, 1024, %s154_s28, [#allocation6], %s844_s5, %s844_s5, %s845_s6  }
  0x13   : > { %596 = dma.hbm_to_vmem [thread:$0]  (!%p591_p9), %s169_s4, 256, %s171_s8, [#allocation6], %s844_s5, %s844_s5, %s845_s6  }
  0x14   : > { %s32_s9 = sadd.s32 1, %s837_s16  ;;  %s41_s10 = sadd.s32 1, %s829_s14 }
  0x15   : > { %p34_p12 = scmp.ge.s32.totalorder %s32_s9, 2  ;;  %p48_p13 = scmp.ne.s32.totalorder %s829_s14, %s825_s13 }
  0x16   : > { %p49_p0 = scmp.eq.s32.totalorder %s841_s17, 0  ;;  %p607_p4 = scmp.lt.s32.totalorder %s841_s17, 2 }
  0x17   : > { %s1040_s9 = smov (%p34_p12, %s32_s9), 0  ;;  %p951_p2 = por %p127_p11, %p48_p13 }
  0x18   : > { %s36_s19 = ssub.s32 %s837_s16, %s1040_s9  ;;  %s184_s23 = sand.u32 1, %s829_s14  }
  0x19   : > { %p39_p6 = scmp.eq.s32.totalorder %s36_s19, 0  ;;  %p50_p8 = por %p49_p0, %p48_p13 }
  0x1a   : > { %s496_s24 = sshll.u32 %s184_s23, 4  ;;  %s549_s18 = sshll.u32 %s837_s16, 4 }
  0x1b   : > { %s961_s25 = scalar_select %p39_p6, %s829_s14, %s41_s10  }
  0x1c   : > { %s195_s29 = scalar_lea.hbm %s1025_s0, %s549_s18  ;;  %s188_s4 = scalar_lea.vmem [#allocation2], %s496_s24 }
  0x1d   : > { %s196_s30 = sshll.u32 %s195_s29, 4  ;;  %s198_s7 = sshll.u32 %s188_s4, 4  ;;  %s197_s30 = int_to_ptr.hbm [resolvable:$true] %s196_s30  ;;  %s199_s7 = int_to_ptr.vmem [resolvable:$true] %s198_s7 }
  0x1e   : > { %p598_p9 = pnand %p607_p4, %p50_p8  ;;  %s185_s8 = scalar_lea.sflag [#allocation3], %s184_s23 }
  0x1f   : > { %210 = sbr.rel (%p924_p7) target bundleno = 212 (0xd4), region = 32  ;;  %s974_s10 = sand.u32 (!%p924_p7), 1, %s825_s13  }
  0x20   : > { %600 = dma.hbm_to_vmem [thread:$0]  (!%p598_p9), %s197_s30, 256, %s199_s7, %s185_s8, %s844_s5, %s844_s5, %s845_s6  }
  0x21   : > { %s500_s19 = sshll.u32 (!%p924_p7), %s974_s10, 4  ;;  %s213_s24 = scalar_lea.sflag (!%p924_p7), [#allocation3], %s974_s10 }
  0x22   : > { %s216_s18 = scalar_lea.vmem (!%p924_p7), [#allocation2], %s500_s19 }
  0x24   : > { %808 = dma.done.wait (%p911_p3), %s213_s24, 256  }
  0x25   : > { %810 = vsyncadd (%p911_p3), %s213_s24, 4294967040 }
  0x26   : > { %812 = dma.done.wait (%p905_p1), [#allocation6], 1280  }
  0x27   : > { %814 = vsyncadd (%p905_p1), [#allocation6], 4294966016  ;;  %v559_v0 = vld [vmem:[#allocation5 + $0x38] sm:$0xff]  ;;  %v558_v1 = vld [vmem:[#allocation5 + $0x30] sm:$0xff]  ;;  %s503_s20 = sshll.u32 %s974_s10, 5  ;;  %s560_s21 = sshll.u32 %s833_s15, 5 }
  0x28   : > { %341 = vmatpush.bf16.msra.mxu0 %v559_v0  ;;  %570 = vmatpush.bf16.msra.mxu1 %v559_v0  ;;  %v557_v2 = vld [vmem:[#allocation5 + $0x28] sm:$0xff]  ;;  %v556_v3 = vld [vmem:[#allocation5 + $0x20] sm:$0xff]  ;;  %v555_v4 = vld [vmem:[#allocation5 + $0x18] sm:$0xff]  ;;  %s249_s26 = scalar_lea.vmem [#allocation8], %s503_s20  ;;  %s378_s23 = scalar_lea.hbm %s1028_s3, %s560_s21 }
  0x29   : > { %v554_v5 = vld [vmem:[#allocation5 + $0x10] sm:$0xff]  ;;  %v553_v6 = vld [vmem:[#allocation5 + $0x8] sm:$0xff]  ;;  %v552_v7 = vld [vmem:[#allocation5] sm:$0xff]  ;;  %s379_s27 = sshll.u32 %s249_s26, 4  ;;  %s381_s28 = sshll.u32 %s378_s23, 4  ;;  %s380_s27 = int_to_ptr.vmem [resolvable:$true] %s379_s27  ;;  %s382_s28 = int_to_ptr.hbm [resolvable:$true] %s381_s28 }
  0x2a   : > { %v550_v8 = vld [vmem:[%s216_s18] sm:$0xff]  ;;  %v551_v9 = vld [vmem:[%s216_s18 + $0x8] sm:$0xff]  ;;  %s365_s15 = scalar_lea.sflag [#allocation4], %s974_s10  ;;  %s769_s29 = sshra.s32 %s382_s28, 4  ;;  %s770_s29 = int_to_ptr.hbm [resolvable:$true] %s769_s29 }
  0x2b   : > { %v562_v10 = vld [vmem:[#allocation7] sm:$0xff]   ;;  %v569_v11 = vld [vmem:[#allocation7 + $0x8] sm:$0xff]   ;;  %s771_s30 = scalar_lea.hbm %s770_s29, 32  ;;  %s775_s8 = scalar_lea.hbm %s1028_s3, 64 }
  0x2c   : > { %342 = vmatpush.bf16.msra.mxu0 %v558_v1  ;;  %571 = vmatpush.bf16.msra.mxu1 %v558_v1  ;;  %v563_v12 = vunpack.c.l.bf16 %v562_v10  ;;  %v567_v13 = vunpack.c.l.bf16 %v569_v11  ;;  %v564_v18 = vunpack.c.h.bf16 %v562_v10  ;;  %v568_v19 = vunpack.c.h.bf16 %v569_v11  ;;  %p772_p1 = scmp.ne.s32.totalorder %s770_s29, %s771_s30  ;;  %p776_p11 = scmp.lt.s32.totalorder %s770_s29, %s1028_s3 }
  0x2d   : > { %p777_p12 = scmp.lt.s32.totalorder %s775_s8, %s771_s30 }
  0x2e   : > { %p773_p3 = pnand %p772_p1, %p951_p2 }
  0x2f   : > { %p778_p13 = por %p777_p12, %p776_p11 }
  0x30   : > { %343 = vmatpush.bf16.msra.mxu0 %v557_v2  ;;  %572 = vmatpush.bf16.msra.mxu1 %v557_v2  ;;  %p774_p7 = pneg %p773_p3 }
  0x32   : > { %p779_p0 = pnand %p778_p13, %p774_p7 }
  0x34   : > { %344 = vmatpush.bf16.msra.mxu0 %v556_v3  ;;  %573 = vmatpush.bf16.msra.mxu1 %v556_v3 }
  0x38   : > { %345 = vmatpush.bf16.msra.mxu0 %v555_v4  ;;  %574 = vmatpush.bf16.msra.mxu1 %v555_v4 }
  0x3c   : > { %346 = vmatpush.bf16.msra.mxu0 %v554_v5  ;;  %575 = vmatpush.bf16.msra.mxu1 %v554_v5 }
  0x40   : > { %347 = vmatpush.bf16.msra.mxu0 %v553_v6  ;;  %576 = vmatpush.bf16.msra.mxu1 %v553_v6 }
  0x44   : > { %348 = vmatpush.bf16.msra.mxu0 %v552_v7  ;;  %577 = vmatpush.bf16.msra.mxu1 %v552_v7 }
  0x47   : > { %349 = vmatmul.bf16.vlgmr.msra.gmra.mxu0 %v550_v8  ;;  %354 = vmatmul.bf16.vlgmr.msra.gmra.mxu1 %v551_v9 }
  0xc4   : > { %v350_v14 = vpop.f32.mrf.mxu0  ;;  %v355_v15 = vpop.f32.mrf.mxu1 }
  0xc5   : > { %v351_v16 = vadd.f32 %v563_v12, %v350_v14  ;;  %v356_v17 = vadd.f32 %v567_v13, %v355_v15 }
  0xc7   : > { %360 = vst [vmem:[%s249_s26] sm:$0xff] %v351_v16 }
  0xc8   : > { %362 = vst [vmem:[%s249_s26 + $0x10] sm:$0xff] %v356_v17 }
  0xcc   : > { %v352_v20 = vpop.f32.mrf.mxu0  ;;  %v357_v21 = vpop.f32.mrf.mxu1 }
  0xcd   : > { %v353_v22 = vadd.f32 %v564_v18, %v352_v20  ;;  %v358_v23 = vadd.f32 %v568_v19, %v357_v21 }
  0xcf   : > { %361 = vst [vmem:[%s249_s26 + $0x8] sm:$0xff] %v353_v22 }
  0xd0   : > { %363 = vst [vmem:[%s249_s26 + $0x18] sm:$0xff] %v358_v23 }
  0xd1   : > { %782 = shalt.err (!%p779_p0)
}
  0xd2   : > { %s847_s10 = smov 128   ;;  %s848_s18 = smov 8  }
  0xd3   : > { %588 = dma.vmem_to_hbm [thread:$0]  (%p951_p2), %s380_s27, 512, %s382_s28, %s365_s15, %s847_s10, %s847_s10, %s848_s18  }
  0xd4 PF: > { %s396_s20 = sand.u32 1, %s821_s12   ;;  %p602_p4 = pnand %p495_p10, %p916_p5 }
  0xd5   : > { %s397_s21 = scalar_lea.sflag [#allocation4], %s396_s20 }
  0xd6   : > { %p603_p6 = pneg %p602_p4 }
  0xd8   : > { %816 = dma.done.wait (%p603_p6), %s397_s21, 512  }
  0xd9   : > { %818 = vsyncadd (%p603_p6), %s397_s21, 4294966784  ;;  %s20_s17 = sadd.s32 1, %s841_s17   ;;  %s1034_s12 = smov %s825_s13 }
  0xda   : > { %p17_p8 = scmp.ge.s32.totalorder %s20_s17, 4   ;;  %s1035_s13 = smov %s829_s14 }
  0xdb   : > { %s1036_s14 = smov %s961_s25  ;;  %s1037_s15 = smov %s837_s16 }
  0xdc   : > { %s1038_s16 = smov %s1040_s9  ;;  %19 = sbr.rel (!%p17_p8) target bundleno = 7 (0x7), region = 86 }
  0xe1   :  { %403 = vsyncpa [#allocation3], 1 }
  0xe2   :  { %405 = vsyncpa [#allocation3 + $0x1], 1 }
  0xe3   :  { %406 = vsyncpa [#allocation6], 1 }
  0xe4   :  { %407 = vsyncpa [#allocation4], 1 }
  0xe5   :  { %409 = vsyncpa [#allocation4 + $0x1], 1 }

</bundles_post_ra>
